<compile_context>
chip_gen: v7x
topology: tpu7x:2x2x1
jax: 0.10.0
libtpu: 0.0.40
codegen_flags: <defaults>
</compile_context>

<pallas_src>
import functools
import sys

import jax
import jax.numpy as jnp
from jax import lax
from jax.experimental import pallas as pl
from jax.experimental.pallas import tpu as pltpu


# ----------------------------------------------------------------------------
# Kernel 1: streaming accumulation of per-split partial joints.
# ----------------------------------------------------------------------------
def _joint_accum_kernel(x_ref, xt_ref, pj_ref):
    # pj_ref: (1, K, K) f32 output block, resident across the "arbitrary" axis.
    @pl.when(pl.program_id(1) == 0)
    def _():
        pj_ref[...] = jnp.zeros_like(pj_ref)

    # p_partial[i, j] = sum_n x[n, i] * xt[n, j]  (contract over the batch dim).
    dims = (((0,), (0,)), ((), ()))
    part = lax.dot_general(
        x_ref[...], xt_ref[...], dims, preferred_element_type=jnp.float32
    )  # (K, K) f32
    pj_ref[...] += part[None, :, :]


# ----------------------------------------------------------------------------
# Kernel 2: one-time finalize (K x K only).
# ----------------------------------------------------------------------------
def _iid_finalize_kernel(pj_ref, loss_ref, loss_nl_ref, *, lamb: float, eps: float):
    k = pj_ref.shape[-1]
    p = jnp.sum(pj_ref[...].astype(jnp.float32), axis=0)  # (K, K)

    # Symmetrize once.  The transpose is done as a tiny one-time MXU identity
    # matmul (contract dim 0 of p with dim 0 of I gives p.T), which lowers
    # unconditionally for any (K, K) shape.
    ii = lax.broadcasted_iota(jnp.int32, (k, k), 0)
    jj = lax.broadcasted_iota(jnp.int32, (k, k), 1)
    eye = (ii == jj).astype(jnp.float32)
    dims = (((0,), (0,)), ((), ()))
    p_t = lax.dot_general(p, eye, dims, preferred_element_type=jnp.float32)

    p = (p + p_t) * 0.5
    p = p / jnp.sum(p)

    p_i = jnp.sum(p, axis=1, keepdims=True)  # (K, 1) marginal, broadcast over cols
    p_j = jnp.sum(p, axis=0, keepdims=True)  # (1, K) marginal, broadcast over rows

    log_p = jnp.log(jnp.maximum(p, eps))
    log_pi = jnp.log(jnp.maximum(p_i, eps))
    log_pj = jnp.log(jnp.maximum(p_j, eps))

    # Shared partial sums: loss = A + lamb*(B + C), loss_no_lamb = A + B + C.
    a = -jnp.sum(p * log_p)
    b = jnp.sum(p * log_pi)
    c = jnp.sum(p * log_pj)

    loss_ref[0, 0] = a + lamb * (b + c)
    loss_nl_ref[0, 0] = a + b + c


# ----------------------------------------------------------------------------
# Wrapper
# ----------------------------------------------------------------------------
def _round_up(x: int, m: int) -> int:
    return ((x + m - 1) // m) * m


def iid_loss(
    x_out,
    x_tf_out,
    lamb: float = 1.0,
    eps: float = sys.float_info.epsilon,
    *,
    tile_n: int = 4096,
    num_core_splits: int = 2,  # v7x has 2 TCs; serial (and harmless) on v5e/v6e.
):
    """Pallas implementation of IIDLoss.forward. Returns (loss, loss_no_lamb)."""
    n, k = x_out.shape
    assert x_tf_out.shape == (n, k)

    # Tile sizing: batch is split across cores, each split chunked by tile_n
    # (multiple of 8).  Ragged N is zero-padded; zero rows add 0 to the joint.
    per_split = _round_up(pl.cdiv(n, num_core_splits), 8)
    tile = min(_round_up(tile_n, 8), per_split)
    chunks = pl.cdiv(per_split, tile)
    per_split = chunks * tile
    padded_n = per_split * num_core_splits
    if padded_n != n:
        pad = padded_n - n
        x_out = jnp.pad(x_out, ((0, pad), (0, 0)))
        x_tf_out = jnp.pad(x_tf_out, ((0, pad), (0, 0)))

    def row_map(c, t):
        return (c * chunks + t, 0)

    # Padded-lane VMEM footprint: 2 inputs x 2 buffers x tile x 128 lanes x 4B,
    # plus the tiny (1, K, K) accumulator block.  Stays far under VMEM on all
    # of v5e / v6e / v7x for the default tile_n.
    partial_joints = pl.pallas_call(
        _joint_accum_kernel,
        out_shape=jax.ShapeDtypeStruct((num_core_splits, k, k), jnp.float32),
        grid=(num_core_splits, chunks),
        in_specs=[
            pl.BlockSpec((tile, k), row_map),
            pl.BlockSpec((tile, k), row_map),
        ],
        out_specs=pl.BlockSpec((1, k, k), lambda c, t: (c, 0, 0)),
        compiler_params=pltpu.CompilerParams(
            dimension_semantics=("parallel", "arbitrary"),
            vmem_limit_bytes=64 * 1024 * 1024,
        ),
    )(x_out, x_tf_out)

    loss, loss_nl = pl.pallas_call(
        functools.partial(_iid_finalize_kernel, lamb=float(lamb), eps=float(eps)),
        out_shape=(
            jax.ShapeDtypeStruct((1, 1), jnp.float32),
            jax.ShapeDtypeStruct((1, 1), jnp.float32),
        ),
        in_specs=[pl.BlockSpec(memory_space=pltpu.MemorySpace.VMEM)],
        out_specs=(
            pl.BlockSpec(memory_space=pltpu.MemorySpace.SMEM),
            pl.BlockSpec(memory_space=pltpu.MemorySpace.SMEM),
        ),
    )(partial_joints)

    return loss[0, 0], loss_nl[0, 0]


# ----------------------------------------------------------------------------
# Pure-JAX reference (mirrors the PyTorch forward, modern-torch branch)
# ----------------------------------------------------------------------------
def _iid_loss_ref(x_out, x_tf_out, lamb: float = 1.0):
    p = jnp.einsum("ni,nj->ij", x_out, x_tf_out)
    p = (p + p.T) / 2.0
    p = p / jnp.sum(p)
    p_i = jnp.sum(p, axis=1, keepdims=True)
    p_j = jnp.sum(p, axis=0, keepdims=True)
    loss = jnp.sum(-p * (jnp.log(p) - lamb * jnp.log(p_j) - lamb * jnp.log(p_i)))
    loss_nl = jnp.sum(-p * (jnp.log(p) - jnp.log(p_j) - jnp.log(p_i)))
    return loss, loss_nl


if __name__ == "__main__":
    key = jax.random.PRNGKey(0)
    k1, k2 = jax.random.split(key)

    # Small shapes: N deliberately NOT a multiple of the tiling to exercise
    # the ragged-batch zero-padding path.
    N, K = 50, 16
    x_out = jax.nn.softmax(jax.random.normal(k1, (N, K), jnp.float32), axis=-1)
    x_tf_out = jax.nn.softmax(jax.random.normal(k2, (N, K), jnp.float32), axis=-1)

    loss, loss_no_lamb = iid_loss(x_out, x_tf_out, lamb=1.0)
    loss = jax.block_until_ready(loss)
    loss_no_lamb = jax.block_until_ready(loss_no_lamb)

    ref_loss, ref_loss_nl = _iid_loss_ref(x_out, x_tf_out, lamb=1.0)
    assert jnp.allclose(loss, ref_loss, rtol=1e-5, atol=1e-6), (loss, ref_loss)
    assert jnp.allclose(loss_no_lamb, ref_loss_nl, rtol=1e-5, atol=1e-6), (
        loss_no_lamb,
        ref_loss_nl,
    )

    print("KERNEL_OK")
</pallas_src>

<mosaic_0001>
module attributes {stable_mosaic.version = 11 : i64} {
  func.func @_joint_accum_kernel(%arg0: i32, %arg1: i32, %arg2: memref<32x16xf32, #tpu.memory_space<vmem>>, %arg3: memref<32x16xf32, #tpu.memory_space<vmem>>, %arg4: memref<1x16x16xf32, #tpu.memory_space<vmem>>) attributes {dimension_semantics = [#tpu.dimension_semantics<parallel>, #tpu.dimension_semantics<arbitrary>], iteration_bounds = array<i64: 2, 1>, scalar_prefetch = 0 : i64, scratch_operands = 0 : i64, tpu.core_type = #tpu.core_type<tc>, window_params = [{transform_indices = @transform_0, window_bounds = array<i64: 32, 16>}, {transform_indices = @transform_1, window_bounds = array<i64: 32, 16>}, {transform_indices = @transform_2, window_bounds = array<i64: 1, 16, 16>}]} {
    %c0_i32 = arith.constant 0 : i32
    %0 = arith.cmpi eq, %arg1, %c0_i32 : i32
    %1 = arith.extui %0 : i1 to i32
    %c0_i32_0 = arith.constant 0 : i32
    %2 = arith.cmpi ne, %1, %c0_i32_0 : i32
    scf.if %2 {
      %cst_10 = arith.constant 0.000000e+00 : f32
      %10 = vector.broadcast %cst_10 : f32 to vector<1x16x16xf32>
      %c0_11 = arith.constant 0 : index
      %c0_12 = arith.constant 0 : index
      %c0_13 = arith.constant 0 : index
      %11 = vector.load %arg4[%c0_11, %c0_12, %c0_13] : memref<1x16x16xf32, #tpu.memory_space<vmem>>, vector<1x16x16xf32>
      tpu.vector_store %arg4[%c0_11, %c0_12, %c0_13], %10 {strides = array<i32>} : memref<1x16x16xf32, #tpu.memory_space<vmem>>, vector<1x16x16xf32>,
    } else {
    }
    %c0 = arith.constant 0 : index
    %c0_1 = arith.constant 0 : index
    %3 = vector.load %arg2[%c0, %c0_1] : memref<32x16xf32, #tpu.memory_space<vmem>>, vector<32x16xf32>
    %c0_2 = arith.constant 0 : index
    %c0_3 = arith.constant 0 : index
    %4 = vector.load %arg3[%c0_2, %c0_3] : memref<32x16xf32, #tpu.memory_space<vmem>>, vector<32x16xf32>
    %cst = arith.constant dense<0.000000e+00> : vector<16x16xf32>
    %5 = tpu.matmul %3, %4, %cst {dimension_numbers = #tpu.dot_dimension_numbers<[0], [0], [1], [1], [0, 1, 1, 1], [], []>} : vector<32x16xf32>, vector<32x16xf32>, vector<16x16xf32> -> vector<16x16xf32>
    %c0_4 = arith.constant 0 : index
    %c0_5 = arith.constant 0 : index
    %c0_6 = arith.constant 0 : index
    %6 = vector.load %arg4[%c0_4, %c0_5, %c0_6] : memref<1x16x16xf32, #tpu.memory_space<vmem>>, vector<1x16x16xf32>
    %7 = vector.shape_cast %5 : vector<16x16xf32> to vector<1x16x16xf32>
    %8 = arith.addf %6, %7 : vector<1x16x16xf32>
    %c0_7 = arith.constant 0 : index
    %c0_8 = arith.constant 0 : index
    %c0_9 = arith.constant 0 : index
    %9 = vector.load %arg4[%c0_7, %c0_8, %c0_9] : memref<1x16x16xf32, #tpu.memory_space<vmem>>, vector<1x16x16xf32>
    tpu.vector_store %arg4[%c0_7, %c0_8, %c0_9], %8 {strides = array<i32>} : memref<1x16x16xf32, #tpu.memory_space<vmem>>, vector<1x16x16xf32>,
    return
  }
  func.func @transform_0(%arg0: i32, %arg1: i32) -> (i32, i32) {
    %c1_i32 = arith.constant 1 : i32
    %0 = arith.muli %arg0, %c1_i32 : i32
    %1 = arith.addi %0, %arg1 : i32
    %c0_i32 = arith.constant 0 : i32
    %c0_i32_0 = arith.constant 0 : i32
    return %1, %c0_i32 : i32, i32
  }
  func.func @transform_1(%arg0: i32, %arg1: i32) -> (i32, i32) {
    %c1_i32 = arith.constant 1 : i32
    %0 = arith.muli %arg0, %c1_i32 : i32
    %1 = arith.addi %0, %arg1 : i32
    %c0_i32 = arith.constant 0 : i32
    %c0_i32_0 = arith.constant 0 : i32
    return %1, %c0_i32 : i32, i32
  }
  func.func @transform_2(%arg0: i32, %arg1: i32) -> (i32, i32, i32) {
    %c0_i32 = arith.constant 0 : i32
    %c0_i32_0 = arith.constant 0 : i32
    %c0_i32_1 = arith.constant 0 : i32
    return %arg0, %c0_i32, %c0_i32_0 : i32, i32, i32
  }
}

</mosaic_0001>

<bundles_post_ra>
// kernel: tpu_custom_call.1
= control target key start
LH: loop header
LB: loop body
LE: loop exit
PB: predicated region body
PF: predicated region fallthrough
CT: control target
= control target key end

     0   :  { %7 = vsyncpa [#allocation3], 0  ;;  %s1013_s0 = inlined_call_operand.hbm [shape: f32[64,16], index: 0, kind: input, shape index: {}]   ;;  %s1014_s1 = inlined_call_operand.hbm [shape: f32[64,16], index: 1, kind: input, shape index: {}]   ;;  %s1015_s2 = inlined_call_operand.hbm [shape: f32[2,16,16], index: 2, kind: output, shape index: {}]  }
   0x1   :  { %9 = vsyncpa [#allocation3 + $0x1], 0 }
   0x2   :  { %10 = vsyncpa [#allocation6], 0 }
   0x3   :  { %12 = vsyncpa [#allocation6 + $0x1], 0 }
   0x4   :  { %13 = vsyncpa [#allocation4], 0 }
   0x5   :  { %15 = vsyncpa [#allocation4 + $0x1], 0  ;;  %s772_s9 = smov 0   ;;  %s774_s10 = smov 0  }
   0x6   :  { %s776_s11 = smov 0   ;;  %s778_s12 = smov 0  }
   0x7   :  { %s780_s13 = smov 0   ;;  %s782_s14 = smov 0  }
   0x8 LB: > { %s480_s15 = sadd.s32 4294967295, %s747_s14   ;;  %s481_s16 = sadd.s32 4294967294, %s747_s14   ;;  %s747_s14 = sphi %s782_s14, %s21_s14   ;;  %s743_s13 = sphi %s780_s13, %s1033_s13   ;;  %s739_s12 = sphi %s778_s12, %s1032_s12   ;;  %s735_s11 = sphi %s776_s11, %s1031_s11   ;;  %s731_s10 = sphi %s774_s10, %s1030_s10   ;;  %s727_s9 = sphi %s772_s9, %s1029_s9  }
   0x9   : > { %s33_s17 = sadd.s32 1, %s743_s13  ;;  %s42_s18 = sadd.s32 1, %s735_s11 }
   0xa   : > { %p35_p0 = scmp.ge.s32.totalorder %s33_s17, 2  ;;  %p49_p1 = scmp.ne.s32.totalorder %s735_s11, %s731_s10 }
   0xb   : > { %p50_p2 = scmp.eq.s32.totalorder %s747_s14, 0  ;;  %p55_p3 = scmp.ne.s32.totalorder %s731_s10, %s727_s9 }
   0xc   : > { %s1035_s17 = smov (%p35_p0, %s33_s17), 0  ;;  %p56_p5 = scmp.eq.s32.totalorder %s480_s15, 0 }
   0xd   : > { %p813_p4 = por %p50_p2, %p49_p1  ;;  %s39_s20 = ssub.s32 %s743_s13, %s1035_s17 }
   0xe   : > { %p107_p6 = scmp.eq.s32.totalorder %s480_s15, 1  ;;  %p40_p7 = scmp.eq.s32.totalorder %s39_s20, 0 }
   0xf   : > { %p819_p8 = por %p56_p5, %p55_p3  ;;  %p113_p10 = scmp.eq.s32.totalorder %s481_s16, 1 }
  0x10   : > { %p823_p9 = por %p107_p6, %p49_p1  ;;  %p546_p13 = scmp.lt.s32.totalorder %s747_s14, 2 }
  0x11   : > { %s1019_s21 = scalar_select %p819_p8, 1, 0 }
  0x12   : > { %s1020_s22 = scalar_select %p823_p9, 1, 0 }
  0x13   : > { %s828_s23 = scalar_select %p40_p7, %s735_s11, %s42_s18  }
  0x14   : > { %p830_p11 = por %p113_p10, %p55_p3  ;;  %s837_s25 = sand.u32 1, %s735_s11  }
  0x15   : > { %s484_s26 = sshll.u32 %s837_s25, 5  ;;  %s501_s27 = sshll.u32 %s743_s13, 9 }
  0x16   : > { %s1021_s24 = scalar_select %p830_p11, 1, 0 }
  0x17   : > { %s846_s30 = scalar_lea.hbm %s1013_s0, %s501_s27  ;;  %s137_s3 = scalar_lea.vmem [#allocation2], %s484_s26 }
  0x18   : > { %s145_s4 = sshll.u32 %s137_s3, 4  ;;  %p854_p0 = pnand %p546_p13, %p813_p4  ;;  %s850_s4 = int_to_ptr.vmem [resolvable:$true] %s145_s4 }
  0x19   : > { %s134_s6 = scalar_lea.sflag [#allocation3], %s837_s25  ;;  %s601_s7 = scalar_lea.hbm %s846_s30, 512 }
  0x1a   : > { %p602_p2 = scmp.ne.s32.totalorder %s846_s30, %s601_s7  ;;  %p603_p3 = pneg %p854_p0 }
  0x1b   : > { %s606_s16 = scalar_lea.hbm %s1013_s0, 1024  ;;  %p607_p4 = scmp.lt.u32.totalorder %s846_s30, %s1013_s0 }
  0x1c   : > { %p604_p5 = pnand %p603_p3, %p602_p2  ;;  %p608_p7 = scmp.lt.u32.totalorder %s606_s16, %s601_s7 }
  0x1d   : > { %p610_p13 = scmp.lt.u32.totalorder %s601_s7, %s846_s30 }
  0x1e   : > { %p605_p6 = pneg %p604_p5  ;;  %p609_p10 = por %p608_p7, %p607_p4 }
  0x20   : > { %p611_p12 = por %p610_p13, %p609_p10 }
  0x22   : > { %p612_p1 = pnand %p611_p12, %p605_p6 }
  0x24   : > { %615 = shalt.err (!%p612_p1)
}
  0x25   : > { %s616_s20 = scalar_lea.vmem %s850_s4, 512  ;;  %s749_s28 = smov [#allocation2]  }
  0x26   : > { %p617_p2 = scmp.ne.s32.totalorder %s850_s4, %s616_s20  ;;  %s621_s29 = sshll.u32 %s749_s28, 4  ;;  %s622_s29 = int_to_ptr.vmem [resolvable:$false] %s621_s29 }
  0x27   : > { %s623_s3 = scalar_lea.vmem %s622_s29, 1024  ;;  %p624_p9 = scmp.lt.s32.totalorder %s850_s4, %s622_s29 }
  0x28   : > { %p619_p5 = pnand %p617_p2, %p603_p3  ;;  %p625_p4 = scmp.lt.s32.totalorder %s623_s3, %s616_s20 }
  0x2a   : > { %p620_p11 = pneg %p619_p5  ;;  %p626_p7 = por %p625_p4, %p624_p9 }
  0x2c   : > { %p627_p10 = pnand %p626_p7, %p620_p11 }
  0x2e   : > { %630 = shalt.err (!%p627_p10)
}
  0x2f   : > { %s750_s7 = smov 128   ;;  %s751_s8 = smov 8  }
  0x30   : > { %538 = dma.hbm_to_vmem [thread:$0]  (!%p854_p0), %s846_s30, 512, %s850_s4, %s134_s6, %s750_s7, %s750_s7, %s751_s8  }
  0x31   : > { %p175_p9 = scmp.lt.s32.totalorder %s747_s14, 3  ;;  %s896_s18 = scalar_lea.hbm %s1014_s1, %s501_s27 }
  0x32   : > { %p1023_p11 = scmp.ge.s32.totalorder %s747_s14, 1  ;;  %s159_s20 = scalar_lea.vmem [#allocation5], %s484_s26 }
  0x33   : > { %s167_s28 = sshll.u32 %s159_s20, 4  ;;  %s156_s30 = scalar_lea.sflag [#allocation6], %s837_s25  ;;  %s906_s28 = int_to_ptr.vmem [resolvable:$true] %s167_s28 }
  0x34   : > { %p900_p12 = pnand %p1023_p11, %p175_p9  ;;  %s631_s4 = scalar_lea.hbm %s896_s18, 512 }
  0x35   : > { %p632_p1 = scmp.ne.s32.totalorder %s896_s18, %s631_s4  ;;  %s636_s29 = scalar_lea.hbm %s1014_s1, 1024 }
  0x36   : > { %p637_p2 = scmp.lt.u32.totalorder %s896_s18, %s1014_s1  ;;  %p638_p5 = scmp.lt.u32.totalorder %s636_s29, %s631_s4 }
  0x37   : > { %p634_p6 = pnand %p632_p1, %p603_p3  ;;  %p640_p7 = scmp.lt.u32.totalorder %s631_s4, %s896_s18 }
  0x38   : > { %p639_p4 = por %p638_p5, %p637_p2 }
  0x39   : > { %p635_p13 = pneg %p634_p6 }
  0x3a   : > { %p641_p10 = por %p640_p7, %p639_p4 }
  0x3c   : > { %p642_p9 = pnand %p641_p10, %p635_p13 }
  0x3e   : > { %645 = shalt.err (!%p642_p9)
}
  0x3f   : > { %s646_s26 = scalar_lea.vmem %s906_s28, 512  ;;  %s752_s16 = smov [#allocation5]  }
  0x40   : > { %p647_p11 = scmp.ne.s32.totalorder %s906_s28, %s646_s26  ;;  %s651_s20 = sshll.u32 %s752_s16, 4  ;;  %s652_s20 = int_to_ptr.vmem [resolvable:$false] %s651_s20 }
  0x41   : > { %s653_s27 = scalar_lea.vmem %s652_s20, 1024  ;;  %p654_p8 = scmp.lt.s32.totalorder %s906_s28, %s652_s20 }
  0x42   : > { %p649_p1 = pnand %p647_p11, %p603_p3  ;;  %p655_p2 = scmp.lt.s32.totalorder %s653_s27, %s646_s26 }
  0x44   : > { %p650_p6 = pneg %p649_p1  ;;  %p656_p5 = por %p655_p2, %p654_p8 }
  0x46   : > { %p657_p4 = pnand %p656_p5, %p650_p6 }
  0x48   : > { %660 = shalt.err (!%p657_p4)
}
  0x49   : > { %541 = dma.hbm_to_vmem [thread:$0]  (!%p854_p0), %s896_s18, 512, %s906_s28, %s156_s30, %s750_s7, %s750_s7, %s751_s8  }
  0x4a   : > { %179 = sbr.rel (%p900_p12) target bundleno = 448 (0x1c0), region = 28  ;;  %s940_s4 = sand.u32 (!%p900_p12), 1, %s731_s10  }
  0x4b   : > { %s491_s6 = sshll.u32 (!%p900_p12), %s940_s4, 5  ;;  %s182_s29 = scalar_lea.sflag (!%p900_p12), [#allocation3], %s940_s4 }
  0x4c   : > { %s185_s5 = scalar_lea.vmem (!%p900_p12), [#allocation2], %s491_s6  ;;  %p1025_p8 = scmp.ne.s32.totalorder (!%p900_p12), %s1019_s21, 0 }
  0x51   : > { %714 = dma.done.wait (%p1025_p8), %s182_s29, 512  }
  0x52   : > { %716 = vsyncadd (%p1025_p8), %s182_s29, 4294966784  ;;  %s191_s25 = scalar_lea.sflag [#allocation6], %s940_s4  ;;  %s194_s7 = scalar_lea.vmem [#allocation5], %s491_s6 }
  0x53   : > { %718 = dma.done.wait (%p1025_p8), %s191_s25, 512  }
  0x54   : > { %720 = vsyncadd (%p1025_p8), %s191_s25, 4294966784  ;;  %v231_v0 = vld [vmem:[%s185_s5] sm:$0xff]  ;;  %v236_v2 = vld [vmem:[%s194_s7 + $0x8] sm:$0xff]  ;;  %s493_s8 = sshll.u32 %s940_s4, 4  ;;  %vm228_vm0 = vcmask 130048   ;;  %v753_v9 = vmov 0.0  }
  0x55   : > { %239 = vxpose.xlu0.b32.start [1/4] (short) (narrow) %v231_v0, 16  ;;  %v235_v1 = vld [vmem:[%s194_s7] sm:$0xff]  ;;  %v232_v3 = vld [vmem:[%s185_s5 + $0x8] sm:$0xff]  ;;  %v237_v5 = vld [vmem:[%s194_s7 + $0x10] sm:$0xff]  ;;  %s219_s21 = scalar_lea.vmem [#allocation7], %s493_s8  ;;  %vm271_vm1 = vcmask 261120  }
  0x56   : > { %v521_v4 = vpack.c.bf16 %v236_v2, %v235_v1  ;;  %v238_v6 = vld [vmem:[%s194_s7 + $0x18] sm:$0xff]  ;;  %v233_v8 = vld [vmem:[%s185_s5 + $0x10] sm:$0xff]  ;;  %230 = vst.msk [vmem:[%s219_s21 + $0x8] sm:$0xff] %vm228_vm0, %v753_v9  ;;  %229 = vst.msk [vmem:[%s219_s21] sm:$0xff] %vm228_vm0, %v753_v9  ;;  %s503_s18 = sshll.u32 %s739_s12, 8  ;;  %s374_s19 = sshll.u32 %s219_s21, 4  ;;  %s962_s19 = int_to_ptr.vmem [resolvable:$true] %s374_s19 }
  0x57   : > { %v525_v7 = vpack.c.bf16 %v238_v6, %v237_v5  ;;  %v234_v10 = vld [vmem:[%s185_s5 + $0x18] sm:$0xff]  ;;  %s960_s3 = scalar_lea.hbm %s1015_s2, %s503_s18  ;;  %s361_s12 = scalar_lea.sflag [#allocation4], %s940_s4 }
  0x58   : > { %522 = vmatprep.subr.bf16.mxu0 %v521_v4  ;;  %s661_s15 = scalar_lea.vmem %s962_s19, 256  ;;  %p1026_p3 = scmp.ne.s32.totalorder %s1020_s22, 0 }
  0x59   : > { %240 = vxpose.xlu0.b32.cont [2/4] (short) (narrow) %v232_v3, 16  ;;  %524 = vmatpush3.bf16.msra.mxu0 %v521_v4  ;;  %p662_p0 = scmp.ne.s32.totalorder %s962_s19, %s661_s15  ;;  %s754_s26 = smov [#allocation7]  }
  0x5a   : > { %526 = vmatprep.subr.bf16.mxu0 %v525_v7  ;;  %s665_s16 = sshll.u32 %s754_s26, 4  ;;  %s666_s16 = int_to_ptr.vmem [resolvable:$false] %s665_s16 }
  0x5b   : > { %p663_p12 = pnand %p662_p0, %p1026_p3  ;;  %s667_s20 = scalar_lea.vmem %s666_s16, 512 }
  0x5c   : > { %p668_p7 = scmp.lt.s32.totalorder %s962_s19, %s666_s16  ;;  %p669_p10 = scmp.lt.s32.totalorder %s667_s20, %s661_s15 }
  0x5d   : > { %241 = vxpose.xlu0.b32.cont [3/4] (short) (narrow) %v233_v8, 16  ;;  %528 = vmatpush3.bf16.msra.mxu0 %v525_v7  ;;  %v354_v13 = vld [vmem:[%s219_s21 + $0x8] sm:$0xff]  ;;  %v353_v14 = vld [vmem:[%s219_s21] sm:$0xff]  ;;  %p664_p13 = pneg %p663_p12 }
  0x5e   : > { %p670_p9 = por %p669_p10, %p668_p7 }
  0x60   : > { %p671_p11 = pnand %p670_p9, %p664_p13 }
  0x61   : > { %242 = vxpose.xlu0.b32.end [4/4] (short) (narrow) %v234_v10, 16 }
  0xd5   : > { %v255_v11 = vpop.trf.xlu0 }
  0xd6   : > { %518 = vmatprep.mubr.msk.f32.mxu0 %vm271_vm1, %v255_v11 }
  0xd9   : > { %v256_v12 = vpop.trf.xlu0 }
  0xda   : > { %519 = vmatmul.mubr.msk.f32.vlgmr.msra.gmra.mrb[0].mxu0 %vm271_vm1, %v256_v12 }
 0x1ad   : > { %v520_v15 = vpop.f32.mrb[0].mxu0 }
 0x1ae   : > { %v356_v16 = vadd.f32 %v520_v15, %v354_v13  ;;  %v344_v17 = vpop.f32.mrb[1].mxu0 }
 0x1af   : > { %v355_v18 = vadd.f32 %v353_v14, %v344_v17 }
 0x1b0   : > { %359 = vst.msk [vmem:[%s219_s21 + $0x8] sm:$0xff] %vm228_vm0, %v356_v16 }
 0x1b1   : > { %358 = vst.msk [vmem:[%s219_s21] sm:$0xff] %vm228_vm0, %v355_v18 }
 0x1b2   : > { %674 = shalt.err (!%p671_p11)
}
 0x1b3   : > { %s675_s27 = scalar_lea.hbm %s960_s3, 256  ;;  %s679_s5 = scalar_lea.hbm %s1015_s2, 512 }
 0x1b4   : > { %p676_p1 = scmp.ne.s32.totalorder %s960_s3, %s675_s27  ;;  %p680_p5 = scmp.lt.u32.totalorder %s960_s3, %s1015_s2 }
 0x1b5   : > { %p681_p4 = scmp.lt.u32.totalorder %s679_s5, %s675_s27  ;;  %p683_p0 = scmp.lt.u32.totalorder %s675_s27, %s960_s3 }
 0x1b6   : > { %p677_p6 = pnand %p676_p1, %p1026_p3 }
 0x1b7   : > { %p682_p8 = por %p681_p4, %p680_p5 }
 0x1b8   : > { %p678_p2 = pneg %p677_p6 }
 0x1b9   : > { %p684_p12 = por %p683_p0, %p682_p8 }
 0x1bb   : > { %p685_p13 = pnand %p684_p12, %p678_p2 }
 0x1bd   : > { %688 = shalt.err (!%p685_p13)
}
 0x1be   : > { %s755_s8 = smov 128   ;;  %s756_s21 = smov 8  }
 0x1bf   : > { %533 = dma.vmem_to_hbm [thread:$0]  (%p1026_p3), %s962_s19, 256, %s960_s3, %s361_s12, %s755_s8, %s755_s8, %s756_s21  }
 0x1c0 PF: > { %s389_s18 = sand.u32 1, %s727_s9   ;;  %p1027_p7 = scmp.ne.s32.totalorder %s1021_s24, 0 }
 0x1c1   : > { %p1028_p10 = scmp.ge.s32.totalorder %s747_s14, 2  ;;  %s390_s28 = scalar_lea.sflag [#allocation4], %s389_s18 }
 0x1c3   : > { %p543_p9 = pnand %p1028_p10, %p1027_p7 }
 0x1c5   : > { %722 = dma.done.wait (!%p543_p9), %s390_s28, 256  }
 0x1c6   : > { %724 = vsyncadd (!%p543_p9), %s390_s28, 4294967040  ;;  %s21_s14 = sadd.s32 1, %s747_s14   ;;  %s1029_s9 = smov %s731_s10 }
 0x1c7   : > { %p18_p11 = scmp.ge.s32.totalorder %s21_s14, 4   ;;  %s1030_s10 = smov %s735_s11 }
 0x1c8   : > { %s1031_s11 = smov %s828_s23  ;;  %s1032_s12 = smov %s743_s13 }
 0x1c9   : > { %s1033_s13 = smov %s1035_s17  ;;  %20 = sbr.rel (!%p18_p11) target bundleno = 8 (0x8), region = 90 }
 0x1d0   :  { %395 = vsyncpa [#allocation3], 1 }
 0x1d1   :  { %397 = vsyncpa [#allocation3 + $0x1], 1 }
 0x1d2   :  { %398 = vsyncpa [#allocation6], 1 }
 0x1d3   :  { %400 = vsyncpa [#allocation6 + $0x1], 1 }
 0x1d4   :  { %401 = vsyncpa [#allocation4], 1 }
 0x1d5   :  { %403 = vsyncpa [#allocation4 + $0x1], 1 }

</bundles_post_ra>
